<compile_context>
chip_gen: v5e
topology: v5e:2x2
jax: 0.10.0
libtpu: 0.0.40
codegen_flags: <defaults>
</compile_context>

<pallas_src>
import functools

import jax
import jax.numpy as jnp
import numpy as np
from jax.experimental import pallas as pl
from jax.experimental.pallas import tpu as pltpu

LANES = 128
SUBLANES = 8
MIN_TILE = SUBLANES * LANES                  # 1024 elements: kernel granularity
TARGET_BLOCK_BYTES = 4 * 1024 * 1024         # per input, per pipeline buffer


def _has_low_precision_vpu():
    """True on chips whose VPU handles bf16/f16 compares natively (v6e/v7x)."""
    try:
        kind = jax.devices()[0].device_kind.lower()
    except Exception:
        return False
    return not any(tag in kind for tag in ("v2", "v3", "v4", "v5"))


def _compare_dtype_for(dtype):
    name = np.dtype(dtype).name
    if name == "float32":
        return jnp.float32
    if name in ("bfloat16", "float16"):
        return dtype if _has_low_precision_vpu() else jnp.float32
    return jnp.float32  # ints / bool / anything else: compare in f32


def _f1_stats_kernel(pred_ref, true_ref, out_ref, *, threshold, compare_dtype,
                     block_rows, valid_rows_last, ragged):
    j = pl.program_id(1)

    @pl.when(j == 0)
    def _init():
        out_ref[...] = jnp.zeros_like(out_ref)

    thr = jnp.asarray(threshold, dtype=compare_dtype)
    p = pred_ref[...].astype(compare_dtype) >= thr
    t = true_ref[...].astype(compare_dtype) >= thr

    pf = p.astype(jnp.float32)
    tf = t.astype(jnp.float32)
    s_any = pf + tf            # contributes sum(p) + sum(t)
    s_both = pf * tf           # contributes sum(p & t)

    def _accumulate(a, b):
        # Sublane-group reduction only (pure VPU vreg adds); cross-lane reduce
        # and the F1 division happen once in the tiny wrapper epilogue.
        out_ref[0, 0] += jnp.sum(a.reshape(-1, SUBLANES, LANES), axis=0)
        out_ref[0, 1] += jnp.sum(b.reshape(-1, SUBLANES, LANES), axis=0)

    if ragged:
        # Only the globally-last block is partial; its out-of-bounds rows hold
        # stale VMEM data and must be masked.  Gate the mask with pl.when so
        # the hot path carries no iota / mask ops.
        is_last = jnp.logical_and(pl.program_id(0) == pl.num_programs(0) - 1,
                                  j == pl.num_programs(1) - 1)

        @pl.when(jnp.logical_not(is_last))
        def _fast():
            _accumulate(s_any, s_both)

        @pl.when(is_last)
        def _masked():
            row = jax.lax.broadcasted_iota(jnp.int32, (block_rows, LANES), 0)
            m = (row < valid_rows_last).astype(jnp.float32)
            _accumulate(s_any * m, s_both * m)
    else:
        _accumulate(s_any, s_both)


def _stats_jnp(pred_flat, true_flat, threshold, compare_dtype):
    """Plain-jnp stats for the tiny (<1024-element) tail / sub-tile inputs."""
    thr = jnp.asarray(threshold, dtype=compare_dtype)
    p = (pred_flat.astype(compare_dtype) >= thr).astype(jnp.float32)
    t = (true_flat.astype(compare_dtype) >= thr).astype(jnp.float32)
    return jnp.sum(p) + jnp.sum(t), jnp.sum(p * t)


def my_f1(pred, true, threshold=0.5):
    """Micro-averaged binary F1 over all elements of `pred` / `true` (any shape)."""
    assert pred.shape == true.shape
    n = int(pred.size)
    assert n > 0

    pred_flat = jnp.ravel(pred)      # reshape only; keeps native dtype
    true_flat = jnp.ravel(true)
    compare_dtype = _compare_dtype_for(pred.dtype)

    n_main = (n // MIN_TILE) * MIN_TILE      # aligned prefix handled by kernel
    n_tail = n - n_main                      # <1024 elements handled in jnp

    s_sum = jnp.float32(0.0)    # sum(p) + sum(t)
    s_both = jnp.float32(0.0)   # sum(p & t)

    if n_main > 0:
        rows = n_main // LANES               # multiple of SUBLANES
        if n_tail == 0:
            pred2d = pred_flat.reshape(rows, LANES)
            true2d = true_flat.reshape(rows, LANES)
        else:
            pred2d = pred_flat[:n_main].reshape(rows, LANES)
            true2d = true_flat[:n_main].reshape(rows, LANES)

        itemsize = max(np.dtype(pred.dtype).itemsize, np.dtype(true.dtype).itemsize)
        budget_rows = (TARGET_BLOCK_BYTES // (LANES * itemsize)) // SUBLANES * SUBLANES
        block_rows = max(SUBLANES, min(budget_rows, rows))
        nb = pl.cdiv(rows, block_rows)
        ragged = (rows % block_rows) != 0
        valid_rows_last = rows - (nb - 1) * block_rows

        # Split across the two TensorCores (v7x) only when it creates no
        # phantom blocks; on single-TC chips it is a harmless serial re-order.
        nchunk = 2 if (nb % 2 == 0 and nb >= 2) else 1
        nsteps = nb // nchunk

        kernel = functools.partial(
            _f1_stats_kernel,
            threshold=float(threshold),
            compare_dtype=compare_dtype,
            block_rows=block_rows,
            valid_rows_last=valid_rows_last,
            ragged=ragged,
        )

        def in_map(c, j):
            return (c * nsteps + j, 0)

        partials = pl.pallas_call(
            kernel,
            out_shape=jax.ShapeDtypeStruct((nchunk, 2, SUBLANES, LANES), jnp.float32),
            grid_spec=pltpu.PrefetchScalarGridSpec(
                num_scalar_prefetch=0,
                grid=(nchunk, nsteps),
                in_specs=[
                    pl.BlockSpec((block_rows, LANES), in_map),
                    pl.BlockSpec((block_rows, LANES), in_map),
                ],
                out_specs=pl.BlockSpec((1, 2, SUBLANES, LANES),
                                       lambda c, j: (c, 0, 0, 0)),
            ),
            compiler_params=pltpu.CompilerParams(
                dimension_semantics=("parallel", "arbitrary"),
                vmem_limit_bytes=32 * 1024 * 1024,
            ),
        )(pred2d, true2d)

        s = jnp.sum(partials, axis=(0, 2, 3))
        s_sum = s_sum + s[0]
        s_both = s_both + s[1]

    if n_tail > 0:
        ts, tb = _stats_jnp(pred_flat[n_main:], true_flat[n_main:],
                            threshold, compare_dtype)
        s_sum = s_sum + ts
        s_both = s_both + tb

    # tp = s_both, fp + fn = s_sum - 2*s_both  ->  micro F1 = 2*s_both / s_sum
    denom = s_sum
    # zero_division=1.0 (smp f1_score default) when there are no positives at all.
    return jnp.where(denom > 0, 2.0 * s_both / jnp.maximum(denom, 1.0), 1.0)


def _my_f1_ref(pred, true, threshold=0.5):
    p = (pred.astype(jnp.float32) >= threshold).astype(jnp.float32)
    t = (true.astype(jnp.float32) >= threshold).astype(jnp.float32)
    tp = jnp.sum(p * t)
    fp = jnp.sum(p * (1.0 - t))
    fn = jnp.sum((1.0 - p) * t)
    denom = 2.0 * tp + fp + fn
    return jnp.where(denom > 0, 2.0 * tp / jnp.maximum(denom, 1.0), 1.0)


if __name__ == "__main__":
    key = jax.random.PRNGKey(0)

    def check(pred, true, thr=0.5):
        score = jax.block_until_ready(my_f1(pred, true, threshold=thr))
        ref = _my_f1_ref(pred, true, threshold=thr)
        assert jnp.allclose(score, ref, atol=1e-5), (score, ref)
        return score

    # Primary small NCHW binary-segmentation style input (runs the kernel,
    # single aligned block, no masking).
    k1, k2, key = jax.random.split(key, 3)
    pred = jax.random.uniform(k1, (2, 4, 16, 16), dtype=jnp.float32)
    true = (jax.random.uniform(k2, (2, 4, 16, 16)) > 0.5).astype(jnp.float32)
    check(pred, true)

    # Sub-tile input (512 elems): handled by the tiny jnp path.
    k1, k2, key = jax.random.split(key, 3)
    pred = jax.random.uniform(k1, (2, 1, 16, 16), dtype=jnp.float32)
    true = (jax.random.uniform(k2, (2, 1, 16, 16)) > 0.5).astype(jnp.float32)
    check(pred, true)

    # Ragged tiny element count (378 elems): jnp path as well.
    k1, k2, key = jax.random.split(key, 3)
    pred = jax.random.uniform(k1, (2, 3, 7, 9), dtype=jnp.float32)
    true = (jax.random.uniform(k2, (2, 3, 7, 9)) > 0.5).astype(jnp.float32)
    check(pred, true)

    # Multi-block aligned case (rows=32768 -> 4 blocks of 8192 rows, 2 chunks).
    k1, k2, key = jax.random.split(key, 3)
    pred = jax.random.uniform(k1, (8, 1, 1024, 512), dtype=jnp.float32)
    true = (jax.random.uniform(k2, (8, 1, 1024, 512)) > 0.5).astype(jnp.float32)
    check(pred, true)

    # Ragged last kernel block + jnp tail (rows=12288 -> blocks 8192+4096,
    # 2 chunks, pl.when-masked last block, 300-element tail).
    n_ragged = 12288 * 128 + 300
    k1, k2, key = jax.random.split(key, 3)
    pred = jax.random.uniform(k1, (n_ragged,), dtype=jnp.float32)
    true = (jax.random.uniform(k2, (n_ragged,)) > 0.5).astype(jnp.float32)
    check(pred, true)

    # bf16 inputs (native-dtype compare on v6e/v7x, f32 upcast on older chips).
    k1, k2, key = jax.random.split(key, 3)
    pred = jax.random.uniform(k1, (4, 1, 64, 64), dtype=jnp.float32).astype(jnp.bfloat16)
    true = (jax.random.uniform(k2, (4, 1, 64, 64)) > 0.5).astype(jnp.bfloat16)
    check(pred, true)

    print("KERNEL_OK")
</pallas_src>

<mosaic_0001>
module attributes {stable_mosaic.version = 11 : i64} {
  func.func @_f1_stats_kernel(%arg0: i32, %arg1: i32, %arg2: memref<16x128xf32, #tpu.memory_space<vmem>>, %arg3: memref<16x128xf32, #tpu.memory_space<vmem>>, %arg4: memref<1x2x8x128xf32, #tpu.memory_space<vmem>>) attributes {dimension_semantics = [#tpu.dimension_semantics<parallel>, #tpu.dimension_semantics<arbitrary>], iteration_bounds = array<i64: 1, 1>, scalar_prefetch = 0 : i64, scratch_operands = 0 : i64, tpu.core_type = #tpu.core_type<tc>, window_params = [{transform_indices = @transform_0, window_bounds = array<i64: 16, 128>}, {transform_indices = @transform_1, window_bounds = array<i64: 16, 128>}, {transform_indices = @transform_2, window_bounds = array<i64: 1, 2, 8, 128>}]} {
    %c0_i32 = arith.constant 0 : i32
    %0 = arith.cmpi eq, %arg1, %c0_i32 : i32
    %1 = arith.extui %0 : i1 to i32
    %c0_i32_0 = arith.constant 0 : i32
    %2 = arith.cmpi ne, %1, %c0_i32_0 : i32
    scf.if %2 {
      %cst_22 = arith.constant 0.000000e+00 : f32
      %31 = vector.broadcast %cst_22 : f32 to vector<1x2x8x128xf32>
      %c0_23 = arith.constant 0 : index
      %c0_24 = arith.constant 0 : index
      %c0_25 = arith.constant 0 : index
      %c0_26 = arith.constant 0 : index
      %32 = vector.load %arg4[%c0_23, %c0_24, %c0_25, %c0_26] : memref<1x2x8x128xf32, #tpu.memory_space<vmem>>, vector<1x2x8x128xf32>
      tpu.vector_store %arg4[%c0_23, %c0_24, %c0_25, %c0_26], %31 {strides = array<i32>} : memref<1x2x8x128xf32, #tpu.memory_space<vmem>>, vector<1x2x8x128xf32>,
    } else {
    }
    %c0 = arith.constant 0 : index
    %c0_1 = arith.constant 0 : index
    %3 = vector.load %arg2[%c0, %c0_1] : memref<16x128xf32, #tpu.memory_space<vmem>>, vector<16x128xf32>
    %cst = arith.constant 5.000000e-01 : f32
    %4 = vector.broadcast %cst : f32 to vector<16x128xf32>
    %5 = arith.cmpf oge, %3, %4 : vector<16x128xf32>
    %c0_2 = arith.constant 0 : index
    %c0_3 = arith.constant 0 : index
    %6 = vector.load %arg3[%c0_2, %c0_3] : memref<16x128xf32, #tpu.memory_space<vmem>>, vector<16x128xf32>
    %cst_4 = arith.constant 5.000000e-01 : f32
    %7 = vector.broadcast %cst_4 : f32 to vector<16x128xf32>
    %8 = arith.cmpf oge, %6, %7 : vector<16x128xf32>
    %9 = arith.extui %5 : vector<16x128xi1> to vector<16x128xi32>
    %10 = arith.sitofp %9 : vector<16x128xi32> to vector<16x128xf32>
    %11 = arith.extui %8 : vector<16x128xi1> to vector<16x128xi32>
    %12 = arith.sitofp %11 : vector<16x128xi32> to vector<16x128xf32>
    %13 = arith.addf %10, %12 : vector<16x128xf32>
    %14 = arith.mulf %10, %12 : vector<16x128xf32>
    %c0_5 = arith.constant 0 : index
    %c0_6 = arith.constant 0 : index
    %c0_7 = arith.constant 0 : index
    %c0_8 = arith.constant 0 : index
    %15 = vector.load %arg4[%c0_5, %c0_6, %c0_7, %c0_8] : memref<1x2x8x128xf32, #tpu.memory_space<vmem>>, vector<1x1x8x128xf32>
    %16 = vector.shape_cast %15 : vector<1x1x8x128xf32> to vector<8x128xf32>
    %17 = vector.shape_cast %13 : vector<16x128xf32> to vector<2x8x128xf32>
    %cst_9 = arith.constant dense<0.000000e+00> : vector<8x128xf32>
    %18 = vector.multi_reduction <add>, %17, %cst_9 [0] : vector<2x8x128xf32> to vector<8x128xf32>
    %19 = arith.addf %16, %18 : vector<8x128xf32>
    %c0_10 = arith.constant 0 : index
    %c0_11 = arith.constant 0 : index
    %c0_12 = arith.constant 0 : index
    %c0_13 = arith.constant 0 : index
    %20 = vector.load %arg4[%c0_10, %c0_11, %c0_12, %c0_13] : memref<1x2x8x128xf32, #tpu.memory_space<vmem>>, vector<1x1x8x128xf32>
    %21 = vector.shape_cast %20 : vector<1x1x8x128xf32> to vector<8x128xf32>
    %22 = vector.shape_cast %19 : vector<8x128xf32> to vector<1x1x8x128xf32>
    tpu.vector_store %arg4[%c0_10, %c0_11, %c0_12, %c0_13], %22 {strides = array<i32>} : memref<1x2x8x128xf32, #tpu.memory_space<vmem>>, vector<1x1x8x128xf32>,
    %c0_14 = arith.constant 0 : index
    %c1 = arith.constant 1 : index
    %c0_15 = arith.constant 0 : index
    %c0_16 = arith.constant 0 : index
    %23 = vector.load %arg4[%c0_14, %c1, %c0_15, %c0_16] : memref<1x2x8x128xf32, #tpu.memory_space<vmem>>, vector<1x1x8x128xf32>
    %24 = vector.shape_cast %23 : vector<1x1x8x128xf32> to vector<8x128xf32>
    %25 = vector.shape_cast %14 : vector<16x128xf32> to vector<2x8x128xf32>
    %cst_17 = arith.constant dense<0.000000e+00> : vector<8x128xf32>
    %26 = vector.multi_reduction <add>, %25, %cst_17 [0] : vector<2x8x128xf32> to vector<8x128xf32>
    %27 = arith.addf %24, %26 : vector<8x128xf32>
    %c0_18 = arith.constant 0 : index
    %c1_19 = arith.constant 1 : index
    %c0_20 = arith.constant 0 : index
    %c0_21 = arith.constant 0 : index
    %28 = vector.load %arg4[%c0_18, %c1_19, %c0_20, %c0_21] : memref<1x2x8x128xf32, #tpu.memory_space<vmem>>, vector<1x1x8x128xf32>
    %29 = vector.shape_cast %28 : vector<1x1x8x128xf32> to vector<8x128xf32>
    %30 = vector.shape_cast %27 : vector<8x128xf32> to vector<1x1x8x128xf32>
    tpu.vector_store %arg4[%c0_18, %c1_19, %c0_20, %c0_21], %30 {strides = array<i32>} : memref<1x2x8x128xf32, #tpu.memory_space<vmem>>, vector<1x1x8x128xf32>,
    return
  }
  func.func @transform_0(%arg0: i32, %arg1: i32) -> (i32, i32) {
    %c1_i32 = arith.constant 1 : i32
    %0 = arith.muli %arg0, %c1_i32 : i32
    %1 = arith.addi %0, %arg1 : i32
    %c0_i32 = arith.constant 0 : i32
    %c0_i32_0 = arith.constant 0 : i32
    return %1, %c0_i32 : i32, i32
  }
  func.func @transform_1(%arg0: i32, %arg1: i32) -> (i32, i32) {
    %c1_i32 = arith.constant 1 : i32
    %0 = arith.muli %arg0, %c1_i32 : i32
    %1 = arith.addi %0, %arg1 : i32
    %c0_i32 = arith.constant 0 : i32
    %c0_i32_0 = arith.constant 0 : i32
    return %1, %c0_i32 : i32, i32
  }
  func.func @transform_2(%arg0: i32, %arg1: i32) -> (i32, i32, i32, i32) {
    %c0_i32 = arith.constant 0 : i32
    %c0_i32_0 = arith.constant 0 : i32
    %c0_i32_1 = arith.constant 0 : i32
    %c0_i32_2 = arith.constant 0 : i32
    return %arg0, %c0_i32, %c0_i32_0, %c0_i32_1 : i32, i32, i32, i32
  }
}

</mosaic_0001>

<bundles_post_ra>
// kernel: tpu_custom_call.1
= control target key start
LH: loop header
LB: loop body
LE: loop exit
PB: predicated region body
PF: predicated region fallthrough
CT: control target
= control target key end

     0   :  { %7 = vsyncpa [#allocation3], 0  ;;  %s238_s0 = inlined_call_operand.hbm [shape: f32[16,128], index: 0, kind: input, shape index: {}]   ;;  %s239_s1 = inlined_call_operand.hbm [shape: f32[16,128], index: 1, kind: input, shape index: {}]   ;;  %s240_s2 = inlined_call_operand.hbm [shape: f32[1,2,8,128], index: 2, kind: output, shape index: {}]  }
   0x1   :  { %8 = vsyncpa [#allocation6], 0 }
   0x2   :  { %9 = vsyncpa [#allocation4], 0  ;;  %s18_s11 = sshll.u32 %s238_s0, 4  ;;  %s199_s12 = smov [#allocation2]   ;;  %s19_s11 = int_to_ptr.hbm [resolvable:$true] %s18_s11 }
   0x3   :  { %s20_s13 = sshll.u32 %s199_s12, 4  ;;  %s35_s16 = sshll.u32 %s239_s1, 4  ;;  %s21_s13 = int_to_ptr.vmem [resolvable:$true] %s20_s13  ;;  %s36_s16 = int_to_ptr.hbm [resolvable:$true] %s35_s16 }
   0x4   :  { %s200_s17 = smov 128   ;;  %s201_s18 = smov 8  }
   0x5   :  { %26 = dma.hbm_to_vmem [thread:$0]  %s19_s11, 256, %s21_s13, [#allocation3], %s200_s17, %s200_s17, %s201_s18  }
   0x6   :  { %s202_s19 = smov [#allocation5]  }
   0x7   :  { %s37_s20 = sshll.u32 %s202_s19, 4  ;;  %s38_s20 = int_to_ptr.vmem [resolvable:$true] %s37_s20 }
   0x8   :  { %43 = dma.hbm_to_vmem [thread:$0]  %s36_s16, 256, %s38_s20, [#allocation6], %s200_s17, %s200_s17, %s201_s18  }
   0x9   :  { %193 = dma.done.wait [#allocation3], 256  }
   0xa   :  { %194 = vsyncadd [#allocation3], 4294967040 }
   0xb   :  { %195 = dma.done.wait [#allocation6], 256  }
   0xc   :  { %196 = vsyncadd [#allocation6], 4294967040  ;;  %v62_v0 = vld [vmem:[#allocation2] sm:$0xff]  ;;  %v63_v1 = vld [vmem:[#allocation2 + $0x8] sm:$0xff]  ;;  %v203_v4 = vmov 0.0   ;;  %s204_s0 = smov [#allocation7]  }
   0xd   :  { %v66_v2 = vld [vmem:[#allocation5] sm:$0xff]  ;;  %vm64_vm0 = vcmp.ge.f32.partialorder %v62_v0, 0.5  ;;  %vm65_vm1 = vcmp.ge.f32.partialorder %v63_v1, 0.5  ;;  %v67_v3 = vld [vmem:[#allocation5 + $0x8] sm:$0xff]  ;;  %s95_s1 = sshll.u32 %s204_s0, 4  ;;  %s97_s23 = sshll.u32 %s240_s2, 4  ;;  %s96_s1 = int_to_ptr.vmem [resolvable:$true] %s95_s1  ;;  %s98_s23 = int_to_ptr.hbm [resolvable:$true] %s97_s23 }
   0xe   :  { %vm68_vm2 = vcmp.ge.f32.partialorder %v66_v2, 0.5  ;;  %vm69_vm3 = vcmp.ge.f32.partialorder %v67_v3, 0.5  ;;  %v111_v5 = vsel %vm64_vm0, 1.0, %v203_v4  ;;  %v112_v6 = vsel %vm65_vm1, 1.0, %v203_v4 }
   0xf   :  { %v113_v7 = vsel %vm68_vm2, 1.0, %v203_v4  ;;  %v114_v8 = vsel %vm69_vm3, 1.0, %v203_v4 }
  0x10   :  { %v78_v9 = vadd.f32 %v113_v7, %v111_v5  ;;  %v80_v10 = vmul.f32 %v113_v7, %v111_v5  ;;  %v79_v11 = vadd.f32 %v114_v8, %v112_v6  ;;  %v81_v12 = vmul.f32 %v114_v8, %v112_v6 }
  0x12   :  { %v83_v13 = vadd.f32 %v79_v11, %v78_v9  ;;  %v88_v14 = vadd.f32 %v81_v12, %v80_v10 }
  0x14   :  { %85 = vst [vmem:[#allocation7] sm:$0xff] %v83_v13 }
  0x15   :  { %90 = vst [vmem:[#allocation7 + $0x8] sm:$0xff] %v88_v14 }
  0x16   :  { %103 = dma.vmem_to_hbm [thread:$0]  %s96_s1, 256, %s98_s23, [#allocation4], %s200_s17, %s200_s17, %s201_s18  }
  0x17   :  { %197 = dma.done.wait [#allocation4], 256  }
  0x18   :  { %198 = vsyncadd [#allocation4], 4294967040 }
  0x19   :  { %108 = vsyncpa [#allocation3], 1 }
  0x1a   :  { %109 = vsyncpa [#allocation6], 1 }
  0x1b   :  { %110 = vsyncpa [#allocation4], 1 }

</bundles_post_ra>
